<compile_context>
chip_gen: v7x
topology: tpu7x:2x2x1
jax: 0.10.0
libtpu: 0.0.40
codegen_flags: <defaults>
</compile_context>

<pallas_src>
import functools

import jax
import jax.numpy as jnp
from jax.experimental import pallas as pl
from jax.experimental.pallas import tpu as pltpu

HIDDEN = 30  # fixed by the torch module (Linear(d_in, 30))


def _keep_mask_i32(counter_i32, seed_i32, thresh_u24):
    """Stateless splitmix-style hash -> keep-test on a 24-bit uniform.

    Pure jnp int32 ops (shifts masked to emulate logical shifts) so the exact
    same code runs inside the Mosaic kernel, in interpret mode, and in the
    pure-JAX reference used for validation.
    """
    x = counter_i32 ^ (seed_i32 * jnp.int32(-1640531527))                     # 0x9E3779B9
    x = (x ^ ((x >> 16) & jnp.int32(0xFFFF))) * jnp.int32(2146187565)         # 0x7FEB352D
    x = (x ^ ((x >> 15) & jnp.int32(0x1FFFF))) * jnp.int32(-2073287029)       # 0x846CA68B
    x = x ^ ((x >> 16) & jnp.int32(0xFFFF))
    # low 24 bits are non-negative in int32, so signed compare == unsigned compare
    return (x & jnp.int32(0xFFFFFF)) >= jnp.int32(thresh_u24)


def _nn_clf_dropout_kernel(seed_ref, x_ref, w1_ref, b1_ref, w2_ref, b2_ref,
                           o_ref, *, thresh, scale, training):
    # ---- lin1 + ReLU (MXU matmul + VPU elementwise); no manual upcast ----
    z = jnp.dot(x_ref[...], w1_ref[...], preferred_element_type=jnp.float32)
    z = z + b1_ref[...].astype(jnp.float32)
    z = jnp.maximum(z, 0.0)

    # ---- dropout (inverted dropout, matches torch.nn.Dropout in train mode) ----
    if training and thresh > 0:
        tb, h = z.shape
        row0 = (pl.program_id(0) * tb).astype(jnp.int32)       # global row offset of this tile
        rows = jax.lax.broadcasted_iota(jnp.int32, (tb, h), 0) + row0
        cols = jax.lax.broadcasted_iota(jnp.int32, (tb, h), 1)
        counter = rows * jnp.int32(h) + cols                    # global element id (wraps ok)
        keep = _keep_mask_i32(counter, seed_ref[0].astype(jnp.int32), thresh)
        z = jnp.where(keep, z * jnp.float32(scale), jnp.float32(0.0))

    # ---- lin2 (output block is lane-dense: padded to 128 lanes) ----
    out = jnp.dot(z.astype(w2_ref.dtype), w2_ref[...],
                  preferred_element_type=jnp.float32)
    out = out + b2_ref[...].astype(jnp.float32)
    o_ref[...] = out.astype(o_ref.dtype)


def nn_clf_dropout_forward(x, w1, b1, w2, b2, seed, *, p_drop=0.3,
                           training=True, block_b=512):
    """x: (B, d_in); w1: (d_in, 30); b1: (1, 30); w2: (30, d_out); b2: (1, d_out)."""
    B, d_in = x.shape
    H = w1.shape[1]
    d_out = w2.shape[1]

    # Lane-dense output: pad the tiny second-layer weights/bias to a multiple of 128
    # so the final store is a full-lane vst; slice back outside the pallas_call.
    d_out_pad = ((d_out + 127) // 128) * 128
    w2_p = jnp.pad(w2, ((0, 0), (0, d_out_pad - d_out)))
    b2_p = jnp.pad(b2, ((0, 0), (0, d_out_pad - d_out)))

    # Batch tile: full batch if small, else block_b rows (multiple of 8).
    # (block_b=512 keeps 2x double-buffered x tiles well under the scoped VMEM
    #  limit on all of v5e/v6e/v7x for modest d_in.)
    tb = B if B <= block_b else block_b
    grid = (pl.cdiv(B, tb),)

    thresh = int(round(float(p_drop) * (1 << 24)))              # keep if u24 >= thresh
    scale = 1.0 / (1.0 - float(p_drop)) if p_drop < 1.0 else 0.0
    kernel = functools.partial(_nn_clf_dropout_kernel,
                               thresh=thresh, scale=scale, training=bool(training))

    seed_arr = jnp.asarray(seed, dtype=jnp.int32).reshape((1,))

    out_padded = pl.pallas_call(
        kernel,
        out_shape=jax.ShapeDtypeStruct((B, d_out_pad), x.dtype),
        grid_spec=pltpu.PrefetchScalarGridSpec(
            num_scalar_prefetch=1,                               # seed lands in SMEM
            grid=grid,
            in_specs=[
                pl.BlockSpec((tb, d_in), lambda i, s: (i, 0)),        # x: tiled over batch
                pl.BlockSpec((d_in, H), lambda i, s: (0, 0)),         # resident weights
                pl.BlockSpec((1, H), lambda i, s: (0, 0)),
                pl.BlockSpec((H, d_out_pad), lambda i, s: (0, 0)),
                pl.BlockSpec((1, d_out_pad), lambda i, s: (0, 0)),
            ],
            out_specs=pl.BlockSpec((tb, d_out_pad), lambda i, s: (i, 0)),
        ),
        compiler_params=pltpu.CompilerParams(
            dimension_semantics=("parallel",),                   # 2 TCs on v7x
        ),
    )(seed_arr, x, w1, b1, w2_p, b2_p)
    return out_padded[:, :d_out]


def nn_clf_dropout_reference(x, w1, b1, w2, b2, seed, *, p_drop=0.3, training=True):
    """Pure-JAX reference with the identical dropout mask (same hash, global row ids)."""
    z = jnp.maximum(x @ w1 + b1, 0.0)
    if training and p_drop > 0.0:
        B, H = z.shape
        thresh = int(round(float(p_drop) * (1 << 24)))
        rows = jax.lax.broadcasted_iota(jnp.int32, (B, H), 0)
        cols = jax.lax.broadcasted_iota(jnp.int32, (B, H), 1)
        counter = rows * jnp.int32(H) + cols
        keep = _keep_mask_i32(counter, jnp.asarray(seed, jnp.int32), thresh)
        z = jnp.where(keep, z * jnp.float32(1.0 / (1.0 - p_drop)), jnp.float32(0.0))
    return z @ w2 + b2


def _init_linear_params(key, fan_in, fan_out):
    """Deterministic init mirroring torch.nn.Linear (U(-1/sqrt(fan_in), 1/sqrt(fan_in)))."""
    kw, kb = jax.random.split(key)
    bound = 1.0 / jnp.sqrt(jnp.float32(fan_in))
    w = jax.random.uniform(kw, (fan_in, fan_out), jnp.float32, -bound, bound)  # pre-transposed
    b = jax.random.uniform(kb, (1, fan_out), jnp.float32, -bound, bound)
    return w, b


if __name__ == "__main__":
    # --- small shapes consistent with the module: x is (batch, d_in) ---
    B, D_IN, D_OUT = 8, 32, 4
    P_DROP = 0.3

    root = jax.random.PRNGKey(0)
    kx, k1, k2 = jax.random.split(root, 3)

    x = jax.random.normal(kx, (B, D_IN), jnp.float32)
    w1, b1 = _init_linear_params(k1, D_IN, HIDDEN)
    w2, b2 = _init_linear_params(k2, HIDDEN, D_OUT)
    seed = 0

    out_train = nn_clf_dropout_forward(x, w1, b1, w2, b2, seed,
                                       p_drop=P_DROP, training=True)
    out_eval = nn_clf_dropout_forward(x, w1, b1, w2, b2, seed,
                                      p_drop=P_DROP, training=False)
    jax.block_until_ready((out_train, out_eval))

    ref_eval = nn_clf_dropout_reference(x, w1, b1, w2, b2, seed,
                                        p_drop=P_DROP, training=False)
    ref_train = nn_clf_dropout_reference(x, w1, b1, w2, b2, seed,
                                         p_drop=P_DROP, training=True)

    assert out_eval.shape == (B, D_OUT) and out_train.shape == (B, D_OUT)
    assert jnp.allclose(out_eval, ref_eval, atol=1e-4, rtol=1e-4), "eval-mode mismatch"
    assert jnp.allclose(out_train, ref_train, atol=1e-4, rtol=1e-4), "train-mode mismatch"

    # --- multi-tile run: exercises the batch grid + per-tile mask offsets ---
    B2, D2 = 1024, 64
    x2 = jax.random.normal(jax.random.PRNGKey(7), (B2, D2), jnp.float32)
    w1b, b1b = _init_linear_params(jax.random.PRNGKey(8), D2, HIDDEN)
    w2b, b2b = _init_linear_params(jax.random.PRNGKey(9), HIDDEN, D_OUT)
    out2 = nn_clf_dropout_forward(x2, w1b, b1b, w2b, b2b, 123,
                                  p_drop=P_DROP, training=True, block_b=256)
    jax.block_until_ready(out2)
    ref2 = nn_clf_dropout_reference(x2, w1b, b1b, w2b, b2b, 123,
                                    p_drop=P_DROP, training=True)
    assert jnp.allclose(out2, ref2, atol=1e-3, rtol=1e-3), "tiled train-mode mismatch"

    # Sanity: empirical keep rate of the dropout mask ~= 1 - p_drop.
    z2 = jnp.maximum(x2 @ w1b + b1b, 0.0)
    rows = jax.lax.broadcasted_iota(jnp.int32, z2.shape, 0)
    cols = jax.lax.broadcasted_iota(jnp.int32, z2.shape, 1)
    keep = _keep_mask_i32(rows * jnp.int32(z2.shape[1]) + cols,
                          jnp.int32(123), int(round(P_DROP * (1 << 24))))
    keep_rate = jnp.mean(keep.astype(jnp.float32))
    assert abs(float(keep_rate) - (1.0 - P_DROP)) < 0.02, "dropout keep-rate off"

    print("KERNEL_OK")
</pallas_src>

<mosaic_0001>
module attributes {stable_mosaic.version = 11 : i64} {
  func.func @_nn_clf_dropout_kernel(%arg0: i32, %arg1: memref<1xi32, #tpu.memory_space<smem>>, %arg2: memref<8x32xf32, #tpu.memory_space<vmem>>, %arg3: memref<32x30xf32, #tpu.memory_space<vmem>>, %arg4: memref<1x30xf32, #tpu.memory_space<vmem>>, %arg5: memref<30x128xf32, #tpu.memory_space<vmem>>, %arg6: memref<1x128xf32, #tpu.memory_space<vmem>>, %arg7: memref<8x128xf32, #tpu.memory_space<vmem>>) attributes {dimension_semantics = [#tpu.dimension_semantics<parallel>], iteration_bounds = array<i64: 1>, scalar_prefetch = 1 : i64, scratch_operands = 0 : i64, tpu.core_type = #tpu.core_type<tc>, window_params = [{transform_indices = @transform_0, window_bounds = array<i64: 8, 32>}, {pipeline_mode = #tpu.pipeline_mode<synchronous>, transform_indices = @transform_1, window_bounds = array<i64: 32, 30>}, {pipeline_mode = #tpu.pipeline_mode<synchronous>, transform_indices = @transform_2, window_bounds = array<i64: 1, 30>}, {pipeline_mode = #tpu.pipeline_mode<synchronous>, transform_indices = @transform_3, window_bounds = array<i64: 30, 128>}, {pipeline_mode = #tpu.pipeline_mode<synchronous>, transform_indices = @transform_4, window_bounds = array<i64: 1, 128>}, {transform_indices = @transform_5, window_bounds = array<i64: 8, 128>}]} {
    %c0 = arith.constant 0 : index
    %c0_0 = arith.constant 0 : index
    %0 = vector.load %arg2[%c0, %c0_0] : memref<8x32xf32, #tpu.memory_space<vmem>>, vector<8x32xf32>
    %c0_1 = arith.constant 0 : index
    %c0_2 = arith.constant 0 : index
    %1 = vector.load %arg3[%c0_1, %c0_2] : memref<32x30xf32, #tpu.memory_space<vmem>>, vector<32x30xf32>
    %cst = arith.constant dense<0.000000e+00> : vector<8x30xf32>
    %2 = tpu.matmul %0, %1, %cst {dimension_numbers = #tpu.dot_dimension_numbers<[1], [0], [0], [1], [0, 0, 1, 1], [], []>} : vector<8x32xf32>, vector<32x30xf32>, vector<8x30xf32> -> vector<8x30xf32>
    %c0_3 = arith.constant 0 : index
    %c0_4 = arith.constant 0 : index
    %3 = vector.load %arg4[%c0_3, %c0_4] : memref<1x30xf32, #tpu.memory_space<vmem>>, vector<1x30xf32>
    %4 = vector.broadcast %3 : vector<1x30xf32> to vector<8x30xf32>
    %5 = arith.addf %2, %4 : vector<8x30xf32>
    %cst_5 = arith.constant 0.000000e+00 : f32
    %6 = vector.broadcast %cst_5 : f32 to vector<8x30xf32>
    %7 = arith.maximumf %5, %6 : vector<8x30xf32>
    %c8_i32 = arith.constant 8 : i32
    %8 = arith.muli %arg0, %c8_i32 : i32
    %9 = tpu.iota {dimensions = array<i32: 0>} : vector<8x30xi32>
    %10 = vector.broadcast %8 : i32 to vector<8x30xi32>
    %11 = arith.addi %9, %10 : vector<8x30xi32>
    %12 = tpu.iota {dimensions = array<i32: 1>} : vector<8x30xi32>
    %c30_i32 = arith.constant 30 : i32
    %13 = vector.broadcast %c30_i32 : i32 to vector<8x30xi32>
    %14 = arith.muli %11, %13 : vector<8x30xi32>
    %15 = arith.addi %14, %12 : vector<8x30xi32>
    %c0_6 = arith.constant 0 : index
    %16 = memref.load %arg1[%c0_6] : memref<1xi32, #tpu.memory_space<smem>>
    %c-1640531527_i32 = arith.constant -1640531527 : i32
    %17 = arith.muli %16, %c-1640531527_i32 : i32
    %18 = vector.broadcast %17 : i32 to vector<8x30xi32>
    %19 = arith.xori %15, %18 : vector<8x30xi32>
    %c16_i32 = arith.constant 16 : i32
    %20 = vector.broadcast %c16_i32 : i32 to vector<8x30xi32>
    %21 = arith.shrsi %19, %20 : vector<8x30xi32>
    %c65535_i32 = arith.constant 65535 : i32
    %22 = vector.broadcast %c65535_i32 : i32 to vector<8x30xi32>
    %23 = arith.andi %21, %22 : vector<8x30xi32>
    %24 = arith.xori %19, %23 : vector<8x30xi32>
    %c2146187565_i32 = arith.constant 2146187565 : i32
    %25 = vector.broadcast %c2146187565_i32 : i32 to vector<8x30xi32>
    %26 = arith.muli %24, %25 : vector<8x30xi32>
    %c15_i32 = arith.constant 15 : i32
    %27 = vector.broadcast %c15_i32 : i32 to vector<8x30xi32>
    %28 = arith.shrsi %26, %27 : vector<8x30xi32>
    %c131071_i32 = arith.constant 131071 : i32
    %29 = vector.broadcast %c131071_i32 : i32 to vector<8x30xi32>
    %30 = arith.andi %28, %29 : vector<8x30xi32>
    %31 = arith.xori %26, %30 : vector<8x30xi32>
    %c-2073287029_i32 = arith.constant -2073287029 : i32
    %32 = vector.broadcast %c-2073287029_i32 : i32 to vector<8x30xi32>
    %33 = arith.muli %31, %32 : vector<8x30xi32>
    %c16_i32_7 = arith.constant 16 : i32
    %34 = vector.broadcast %c16_i32_7 : i32 to vector<8x30xi32>
    %35 = arith.shrsi %33, %34 : vector<8x30xi32>
    %c65535_i32_8 = arith.constant 65535 : i32
    %36 = vector.broadcast %c65535_i32_8 : i32 to vector<8x30xi32>
    %37 = arith.andi %35, %36 : vector<8x30xi32>
    %38 = arith.xori %33, %37 : vector<8x30xi32>
    %c16777215_i32 = arith.constant 16777215 : i32
    %39 = vector.broadcast %c16777215_i32 : i32 to vector<8x30xi32>
    %40 = arith.andi %38, %39 : vector<8x30xi32>
    %c5033165_i32 = arith.constant 5033165 : i32
    %41 = vector.broadcast %c5033165_i32 : i32 to vector<8x30xi32>
    %42 = arith.cmpi sge, %40, %41 : vector<8x30xi32>
    %cst_9 = arith.constant 1.42857146 : f32
    %43 = vector.broadcast %cst_9 : f32 to vector<8x30xf32>
    %44 = arith.mulf %7, %43 : vector<8x30xf32>
    %cst_10 = arith.constant 0.000000e+00 : f32
    %45 = vector.broadcast %cst_10 : f32 to vector<8x30xf32>
    %46 = arith.select %42, %44, %45 : vector<8x30xi1>, vector<8x30xf32>
    %c0_11 = arith.constant 0 : index
    %c0_12 = arith.constant 0 : index
    %47 = vector.load %arg5[%c0_11, %c0_12] : memref<30x128xf32, #tpu.memory_space<vmem>>, vector<30x128xf32>
    %cst_13 = arith.constant dense<0.000000e+00> : vector<8x128xf32>
    %48 = tpu.matmul %46, %47, %cst_13 {dimension_numbers = #tpu.dot_dimension_numbers<[1], [0], [0], [1], [0, 0, 1, 1], [], []>} : vector<8x30xf32>, vector<30x128xf32>, vector<8x128xf32> -> vector<8x128xf32>
    %c0_14 = arith.constant 0 : index
    %c0_15 = arith.constant 0 : index
    %49 = vector.load %arg6[%c0_14, %c0_15] : memref<1x128xf32, #tpu.memory_space<vmem>>, vector<1x128xf32>
    %50 = vector.broadcast %49 : vector<1x128xf32> to vector<8x128xf32>
    %51 = arith.addf %48, %50 : vector<8x128xf32>
    %c0_16 = arith.constant 0 : index
    %c0_17 = arith.constant 0 : index
    %52 = vector.load %arg7[%c0_16, %c0_17] : memref<8x128xf32, #tpu.memory_space<vmem>>, vector<8x128xf32>
    tpu.vector_store %arg7[%c0_16, %c0_17], %51 {strides = array<i32>} : memref<8x128xf32, #tpu.memory_space<vmem>>, vector<8x128xf32>,
    return
  }
  func.func @transform_0(%arg0: i32, %arg1: memref<1xi32, #tpu.memory_space<smem>>) -> (i32, i32) {
    %c0_i32 = arith.constant 0 : i32
    %c0_i32_0 = arith.constant 0 : i32
    return %arg0, %c0_i32 : i32, i32
  }
  func.func @transform_1(%arg0: i32, %arg1: memref<1xi32, #tpu.memory_space<smem>>) -> (i32, i32) {
    %c0_i32 = arith.constant 0 : i32
    %c0_i32_0 = arith.constant 0 : i32
    %c0_i32_1 = arith.constant 0 : i32
    return %c0_i32, %c0_i32_0 : i32, i32
  }
  func.func @transform_2(%arg0: i32, %arg1: memref<1xi32, #tpu.memory_space<smem>>) -> (i32, i32) {
    %c0_i32 = arith.constant 0 : i32
    %c0_i32_0 = arith.constant 0 : i32
    %c0_i32_1 = arith.constant 0 : i32
    return %c0_i32, %c0_i32_0 : i32, i32
  }
  func.func @transform_3(%arg0: i32, %arg1: memref<1xi32, #tpu.memory_space<smem>>) -> (i32, i32) {
    %c0_i32 = arith.constant 0 : i32
    %c0_i32_0 = arith.constant 0 : i32
    %c0_i32_1 = arith.constant 0 : i32
    return %c0_i32, %c0_i32_0 : i32, i32
  }
  func.func @transform_4(%arg0: i32, %arg1: memref<1xi32, #tpu.memory_space<smem>>) -> (i32, i32) {
    %c0_i32 = arith.constant 0 : i32
    %c0_i32_0 = arith.constant 0 : i32
    %c0_i32_1 = arith.constant 0 : i32
    return %c0_i32, %c0_i32_0 : i32, i32
  }
  func.func @transform_5(%arg0: i32, %arg1: memref<1xi32, #tpu.memory_space<smem>>) -> (i32, i32) {
    %c0_i32 = arith.constant 0 : i32
    %c0_i32_0 = arith.constant 0 : i32
    return %arg0, %c0_i32 : i32, i32
  }
}

</mosaic_0001>

<bundles_post_ra>
// kernel: tpu_custom_call.1
= control target key start
LH: loop header
LB: loop body
LE: loop exit
PB: predicated region body
PF: predicated region fallthrough
CT: control target
= control target key end

     0   :  { %12 = vsyncpa [#allocation5], 0  ;;  %s548_s0 = inlined_call_operand.<no memory space> [shape: s32[1], index: 0, kind: input, shape index: {}]   ;;  %s549_s1 = inlined_call_operand.hbm [shape: f32[8,32], index: 1, kind: input, shape index: {}]   ;;  %s550_s2 = inlined_call_operand.hbm [shape: f32[32,30], index: 2, kind: input, shape index: {}]   ;;  %s551_s3 = inlined_call_operand.vmem [shape: f32[1,30], index: 3, kind: input, shape index: {}]   ;;  %s552_s4 = inlined_call_operand.hbm [shape: f32[30,128], index: 4, kind: input, shape index: {}]   ;;  %s553_s5 = inlined_call_operand.vmem [shape: f32[1,128], index: 5, kind: input, shape index: {}]   ;;  %s554_s6 = inlined_call_operand.hbm [shape: f32[8,128], index: 6, kind: output, shape index: {}]  }
   0x1   :  { %13 = vsyncpa [#allocation8], 0 }
   0x2   :  { %14 = vsyncpa [#allocation6], 0  ;;  %s440_s21 = smov [#allocation7]   ;;  %s346_s25 = scalar_lea.hbm %s550_s2, 512 }
   0x3   :  { %s30_s22 = sshll.u32 %s440_s21, 4  ;;  %p347_p0 = scmp.ne.s32.totalorder %s550_s2, %s346_s25  ;;  %s31_s22 = int_to_ptr.vmem [resolvable:$true] %s30_s22 }
   0x4   :  { %p350_p1 = scmp.lt.u32.totalorder %s346_s25, %s550_s2 }
   0x6   :  { %p352_p2 = pnand %p350_p1, %p347_p0 }
   0x8   :  { %355 = shalt.err (!%p352_p2)
}
   0x9   :  { %s356_s30 = scalar_lea.vmem %s31_s22, 512  ;;  %p361_p4 = scmp.lt.s32.totalorder %s31_s22, %s31_s22 }
   0xa   :  { %p357_p3 = scmp.ne.s32.totalorder %s31_s22, %s356_s30  ;;  %p362_p5 = scmp.lt.s32.totalorder %s356_s30, %s356_s30 }
   0xc   :  { %p363_p6 = por %p362_p5, %p361_p4 }
   0xe   :  { %p364_p7 = pnand %p363_p6, %p357_p3 }
  0x10   :  { %367 = shalt.err (!%p364_p7)
}
  0x11   :  { %s441_s7 = smov 128   ;;  %s442_s8 = smov 8  }
  0x12   :  { %36 = dma.hbm_to_vmem [thread:$0]  %s550_s2, 512, %s31_s22, [#allocation8], %s441_s7, %s441_s7, %s442_s8  }
  0x13   :  { %s443_s11 = smov [#allocation4]   ;;  %s444_s13 = smov [#allocation9]  }
  0x14   :  { %s21_s12 = sshll.u32 %s443_s11, 4  ;;  %s44_s14 = sshll.u32 %s444_s13, 4  ;;  %s22_s12 = int_to_ptr.vmem [resolvable:$true] %s21_s12  ;;  %s45_s14 = int_to_ptr.vmem [resolvable:$true] %s44_s14 }
  0x15   :  { %s368_s17 = scalar_lea.hbm %s549_s1, 128 }
  0x16   :  { %p369_p8 = scmp.ne.s32.totalorder %s549_s1, %s368_s17  ;;  %p372_p9 = scmp.lt.u32.totalorder %s368_s17, %s549_s1 }
  0x18   :  { %p374_p10 = pnand %p372_p9, %p369_p8 }
  0x1a   :  { %377 = shalt.err (!%p374_p10)
}
  0x1b   :  { %s378_s2 = scalar_lea.vmem %s22_s12, 128  ;;  %p383_p12 = scmp.lt.s32.totalorder %s22_s12, %s22_s12 }
  0x1c   :  { %p379_p11 = scmp.ne.s32.totalorder %s22_s12, %s378_s2  ;;  %p384_p13 = scmp.lt.s32.totalorder %s378_s2, %s378_s2 }
  0x1e   :  { %p385_p0 = por %p384_p13, %p383_p12 }
  0x20   :  { %p386_p1 = pnand %p385_p0, %p379_p11 }
  0x22   :  { %389 = shalt.err (!%p386_p1)
}
  0x23   :  { %24 = dma.hbm_to_vmem [thread:$0]  %s549_s1, 128, %s22_s12, [#allocation5]  }
  0x24   :  { %s390_s26 = scalar_lea.hbm %s552_s4, 512 }
  0x25   :  { %p391_p2 = scmp.ne.s32.totalorder %s552_s4, %s390_s26  ;;  %p394_p3 = scmp.lt.u32.totalorder %s390_s26, %s552_s4 }
  0x27   :  { %p396_p4 = pnand %p394_p3, %p391_p2 }
  0x29   :  { %399 = shalt.err (!%p396_p4)
}
  0x2a   :  { %s400_s9 = scalar_lea.vmem %s45_s14, 512  ;;  %p405_p6 = scmp.lt.s32.totalorder %s45_s14, %s45_s14 }
  0x2b   :  { %p401_p5 = scmp.ne.s32.totalorder %s45_s14, %s400_s9  ;;  %p406_p7 = scmp.lt.s32.totalorder %s400_s9, %s400_s9 }
  0x2d   :  { %p407_p8 = por %p406_p7, %p405_p6 }
  0x2f   :  { %p408_p9 = pnand %p407_p8, %p401_p5 }
  0x31   :  { %411 = shalt.err (!%p408_p9)
}
  0x32   :  { %50 = dma.hbm_to_vmem [thread:$0]  %s552_s4, 512, %s45_s14, [#allocation8], %s441_s7, %s441_s7, %s442_s8  }
  0x33   :  { %434 = dma.done.wait [#allocation5], 128  }
  0x34   :  { %435 = vsyncadd [#allocation5], 4294967168 }
  0x35   :  { %436 = dma.done.wait [#allocation8], 1024  }
  0x36   :  { %437 = vsyncadd [#allocation8], 4294966272  ;;  %v445_v0 = vmov 0.0|0.0   ;;  %vm446_vm0 = vmmov 0   ;;  %v447_v1 = vmov 0.0   ;;  %v63_v2 = vld [vmem:[#allocation7] sm:$0xff]  ;;  %v150_v15 = vlaneseq }
  0x37   :  { %323 = vmatprep.subr.bf16.mxu0 %v445_v0  ;;  %309 = vmatprep.mubr.msk.f32.mxu0 %vm446_vm0, %v447_v1  ;;  %v64_v3 = vld [vmem:[#allocation7 + $0x8] sm:$0xff]  ;;  %v65_v4 = vld [vmem:[#allocation7 + $0x10] sm:$0xff]  ;;  %v66_v6 = vld [vmem:[#allocation7 + $0x18] sm:$0xff]  ;;  %vm74_vm1 = vcmask 261120   ;;  %vm192_vm2 = vcmask 1045504   ;;  %vm448_vm3 = vmmov 1  }
  0x38   :  { %329 = vmatprep.subr.bf16.mxu1 %v445_v0  ;;  %320 = vmatprep.mubr.msk.f32.mxu1 %vm446_vm0, %v447_v1  ;;  %v324_v5 = vpack.c.bf16 %v64_v3, %v63_v2  ;;  %v327_v7 = vpack.c.bf16 %v66_v6, %v65_v4  ;;  %v62_v8 = vld [vmem:[#allocation4] sm:$0xff]  ;;  %v177_v9 = vld [vmem:[#allocation9] sm:$0xff]  ;;  %v178_v10 = vld [vmem:[#allocation9 + $0x8] sm:$0xff]  ;;  %v151_v16 = vshrl.u32 %v150_v15, 7  ;;  %v155_v17 = vand.u32 127, %v150_v15  ;;  %s449_s14 = smov [#allocation10]  }
  0x39   :  { %v330_v11 = vpack.c.bf16 %v178_v10, %v177_v9  ;;  %v179_v12 = vld [vmem:[#allocation9 + $0x10] sm:$0xff]  ;;  %v180_v13 = vld [vmem:[#allocation9 + $0x18] sm:$0x3f]  ;;  %vm334_vm4 = vmpackc.low %vm192_vm2, %vm448_vm3  ;;  %s159_s8 = smul.u32 2654435769, %s548_s0  ;;  %vm188_vm6 = vcmask 244736  }
  0x3a   :  { %325 = vmatpush3.bf16.msra.mxu0 %v324_v5  ;;  %v333_v14 = vpack.c.bf16 %v180_v13, %v179_v12  ;;  %v156_v18 = vmul.u32 30, %v151_v16  ;;  %v283_v30 = vld [vmem:[%s551_s3] ss:$0 sm:$0xff]  ;;  %s273_s15 = sshll.u32 %s449_s14, 4  ;;  %s274_s15 = int_to_ptr.vmem [resolvable:$true] %s273_s15 }
  0x3b   :  { %326 = vmatprep.subr.bf16.mxu0 %v445_v0  ;;  %331 = vmatpush3.bf16.msra.mxu1 %v330_v11  ;;  %v160_v20 = vstv %s159_s8  ;;  %v288_v38 = vld [vmem:[%s553_s5] ss:$0 sm:$0xff]  ;;  %s412_s3 = scalar_lea.vmem %s274_s15, 128  ;;  %p417_p11 = scmp.lt.s32.totalorder %s274_s15, %s274_s15 }
  0x3c   :  { %332 = vmatprep.subr.bf16.mxu1 %v445_v0  ;;  %v157_v19 = vadd.s32 %v156_v18, %v155_v17  ;;  %p413_p10 = scmp.ne.s32.totalorder %s274_s15, %s412_s3  ;;  %p418_p12 = scmp.lt.s32.totalorder %s412_s3, %s412_s3 }
  0x3e   :  { %328 = vmatpush3.bf16.msra.mxu0 %v327_v7  ;;  %v161_v21 = vxor.u32 %v160_v20, %v157_v19  ;;  %p419_p13 = por %p418_p12, %p417_p11 }
  0x3f   :  { %335 = vmatpush3.bf16.msk.msra.mxu1 %vm334_vm4, %v333_v14 }
  0x40   :  { %v285_v22 = vshrl.u32 %v161_v21, 16  ;;  %p420_p0 = pnand %p419_p13, %p413_p10 }
  0x41   :  { %310 = vmatmul.mubr.msk.f32.vlgmr.msra.gmra.mrb[0].mxu0 %vm74_vm1, %v62_v8 }
  0x42   :  { %v164_v23 = vxor.u32 %v285_v22, %v161_v21 }
  0x44   :  { %v165_v24 = vmul.u32 2146187565, %v164_v23 }
  0x46   :  { %v286_v25 = vshrl.u32 %v165_v24, 15 }
  0x48   :  { %v168_v26 = vxor.u32 %v286_v25, %v165_v24 }
  0x4a   :  { %v169_v27 = vmul.u32 2221680267, %v168_v26 }
  0x4c   :  { %v287_v28 = vshrl.u32 %v169_v27, 16 }
  0x4e   :  { %v172_v29 = vxor.u32 %v287_v28, %v169_v27 }
  0x50   :  { %v173_v32 = vand.u32 16777215, %v172_v29 }
  0x52   :  { %vm174_vm5 = vcmp.ge.s32.totalorder %v173_v32, 5033165 }
 0x114   :  { %v144_v31 = vpop.f32.mrb[0].mxu0 }
 0x115   :  { %v145_v33 = vadd.f32 %v283_v30, %v144_v31  ;;  %v311_v34 = vpop.f32.mrb[1].mxu0 }
 0x117   :  { %v148_v35 = vmax.f32 %v145_v33, 0.0 }
 0x119   :  { %v175_v36 = vmul.f32 1.4285715, %v148_v35 }
 0x11b   :  { %v176_v37 = vsel %vm174_vm5, %v175_v36, 0.0 }
 0x11c   :  { %321 = vmatmul.mubr.msk.f32.vlgmr.msra.gmra.mrb[0].mxu1 %vm188_vm6, %v176_v37 }
 0x1ef   :  { %v262_v39 = vpop.f32.mrb[0].mxu1 }
 0x1f0   :  { %v263_v40 = vadd.f32 %v288_v38, %v262_v39  ;;  %v322_v41 = vpop.f32.mrb[1].mxu1 }
 0x1f2   :  { %266 = vst [vmem:[#allocation10] sm:$0xff] %v263_v40 }
 0x1f3   :  { %423 = shalt.err (!%p420_p0)
}
 0x1f4   :  { %s424_s18 = scalar_lea.hbm %s554_s6, 128 }
 0x1f5   :  { %p425_p1 = scmp.ne.s32.totalorder %s554_s6, %s424_s18  ;;  %p428_p2 = scmp.lt.u32.totalorder %s424_s18, %s554_s6 }
 0x1f7   :  { %p430_p3 = pnand %p428_p2, %p425_p1 }
 0x1f9   :  { %433 = shalt.err (!%p430_p3)
}
 0x1fa   :  { %276 = dma.vmem_to_hbm [thread:$0]  %s274_s15, 128, %s554_s6, [#allocation6]  }
 0x1fb   :  { %438 = dma.done.wait [#allocation6], 128  }
 0x1fc   :  { %439 = vsyncadd [#allocation6], 4294967168 }
 0x1fd   :  { %280 = vsyncpa [#allocation5], 1 }
 0x1fe   :  { %281 = vsyncpa [#allocation8], 1 }
 0x1ff   :  { %282 = vsyncpa [#allocation6], 1 }

</bundles_post_ra>
